<compile_context>
chip_gen: v5e
topology: v5e:2x2
jax: 0.10.0
libtpu: 0.0.40
codegen_flags: <defaults>
</compile_context>

<pallas_src>
import functools

import numpy as np
import jax
import jax.numpy as jnp
from jax import lax
from jax.experimental import pallas as pl
from jax.experimental.pallas import tpu as pltpu

STATE_DIM = 21
_FLAT = STATE_DIM * STATE_DIM          # 441
_LANES = 512                           # 441 padded to full 128-lane tiles
_BT = 8                                # batch tile (one sublane tile)
_LN10 = float(np.log(10.0))

# (row_lo, row_hi, base_coefficient, factor_index) — mirrors the torch forward.
# Diagonal entries 2 and 5..8 stay zero and factor index 2 is unused, exactly
# as in the original module.
_BLOCKS = (
    (0, 2, 1e-06, 0),    # nav rotation matrix   * factor[0] * EYE2
    (3, 5, 0.1, 1),      # nav velocity          * factor[1] * EYE2
    (9, 12, 1e-08, 3),   # gyroscope bias        * factor[3] * EYE3
    (12, 15, 0.001, 4),  # accelerometer bias    * factor[4] * EYE3
    (15, 18, 1e-05, 5),  # car rotation matrix   * factor[5] * EYE3
    (18, 21, 0.01, 5),   # car position          * factor[5] * EYE3
)


def _state_cov_kernel(x_ref, w_ref, out_ref):
    """Single sample. x_ref: (1,) SMEM; w_ref: (6,) SMEM; out_ref: (21,21) VMEM."""
    x = x_ref[0]
    r = lax.broadcasted_iota(jnp.int32, (STATE_DIM, STATE_DIM), 0)
    c = lax.broadcasted_iota(jnp.int32, (STATE_DIM, STATE_DIM), 1)
    diag = r == c
    wmap = jnp.zeros((STATE_DIM, STATE_DIM), jnp.float32)   # fc weight per live diag entry
    cmap = jnp.zeros((STATE_DIM, STATE_DIM), jnp.float32)   # base coefficient per live diag entry
    for lo, hi, coef, k in _BLOCKS:                          # statically unrolled (6 blocks)
        in_blk = diag & (r >= lo) & (r < hi)
        wmap = jnp.where(in_blk, w_ref[k], wmap)
        cmap = jnp.where(in_blk, jnp.float32(coef), cmap)
    # fc -> tanh -> 10**(.) evaluated on the whole tile (EUP); cmap zeroes
    # every entry that is not a live diagonal element (tanh(0)=0 -> f=1 there).
    factor = jnp.exp(jnp.tanh(wmap * x) * _LN10)
    out_ref[...] = cmap * factor


def _state_cov_kernel_batched(w_ref, x_ref, out_ref):
    """Batched. w_ref: (6,) SMEM; x_ref: (_BT, 1) VMEM; out_ref: (_BT, _LANES) VMEM.

    out[b, 22*i] = cov(x[b])[i, i]; every other lane is zero (lane 22*i is the
    row-major flattened position of diag entry i of a 21x21 matrix).
    """
    lane = lax.broadcasted_iota(jnp.int32, (1, _LANES), 1)
    wmap = jnp.zeros((1, _LANES), jnp.float32)
    cmap = jnp.zeros((1, _LANES), jnp.float32)
    for lo, hi, coef, k in _BLOCKS:
        in_blk = functools.reduce(
            jnp.logical_or,
            [lane == i * (STATE_DIM + 1) for i in range(lo, hi)])
        wmap = jnp.where(in_blk, w_ref[k], wmap)
        cmap = jnp.where(in_blk, jnp.float32(coef), cmap)
    factor = jnp.exp(jnp.tanh(wmap * x_ref[...]) * _LN10)   # (_BT, _LANES)
    out_ref[...] = cmap * factor


@jax.jit
def state_covariance_forward(x, weight):
    """Module-faithful forward: x (1,), weight (6, 1) -> (21, 21) covariance."""
    x1 = x.reshape(1).astype(jnp.float32)
    w = weight.reshape(6).astype(jnp.float32)
    return pl.pallas_call(
        _state_cov_kernel,
        out_shape=jax.ShapeDtypeStruct((STATE_DIM, STATE_DIM), jnp.float32),
        in_specs=[
            pl.BlockSpec(memory_space=pltpu.MemorySpace.SMEM),   # x scalar
            pl.BlockSpec(memory_space=pltpu.MemorySpace.SMEM),   # fc weight (6,)
        ],
        out_specs=pl.BlockSpec((STATE_DIM, STATE_DIM), lambda: (0, 0)),
        cost_estimate=pl.CostEstimate(
            flops=30 * _FLAT,
            transcendentals=2 * _FLAT,
            bytes_accessed=4 * (1 + 6 + _FLAT),
        ),
    )(x1, w)


@jax.jit
def state_covariance_forward_batched(xs, weight):
    """Amortized forward: xs (B,), weight (6, 1) -> (B, 512) lane-dense rows.

    Row layout: out[b, 22*i] = cov(xs[b])[i, i]; all other lanes are zero.
    Keeping the output flat & lane-padded avoids the relayout a per-sample
    (21, 21) reshape would cost; consumers read the 21 diagonal lanes.
    """
    b = xs.shape[0]
    bp = ((b + _BT - 1) // _BT) * _BT
    x2 = xs.reshape(b, 1).astype(jnp.float32)
    if bp != b:
        x2 = jnp.zeros((bp, 1), jnp.float32).at[:b].set(x2)
    w = weight.reshape(6).astype(jnp.float32)
    out = pl.pallas_call(
        _state_cov_kernel_batched,
        out_shape=jax.ShapeDtypeStruct((bp, _LANES), jnp.float32),
        grid=(bp // _BT,),
        in_specs=[
            pl.BlockSpec(memory_space=pltpu.MemorySpace.SMEM),   # fc weight (6,)
            pl.BlockSpec((_BT, 1), lambda i: (i, 0)),            # x batch tile
        ],
        out_specs=pl.BlockSpec((_BT, _LANES), lambda i: (i, 0)),
        compiler_params=pltpu.CompilerParams(
            dimension_semantics=("parallel",)),
        cost_estimate=pl.CostEstimate(
            flops=4 * bp * _LANES + 30 * _LANES,
            transcendentals=2 * bp * _LANES,
            bytes_accessed=4 * (6 + bp + bp * _LANES),
        ),
    )(w, x2)
    return out[:b] if bp != b else out


def _reference(x, weight):
    """Pure-JAX reference of the torch forward (float32)."""
    f = 10.0 ** jnp.tanh(weight.reshape(6, 1) @ x.reshape(1, 1)).reshape(6)
    cov = jnp.zeros((STATE_DIM, STATE_DIM), jnp.float32)
    for lo, hi, coef, k in _BLOCKS:
        eye = jnp.eye(hi - lo, dtype=jnp.float32)
        cov = cov.at[lo:hi, lo:hi].set(coef * f[k] * eye)
    return cov


if __name__ == "__main__":
    key = jax.random.PRNGKey(0)
    kw, kx = jax.random.split(key)
    # nn.Linear(1, 6) default init: U(-1, 1) (since 1/sqrt(in_features) == 1),
    # then the module divides the weight by 10.
    weight = jax.random.uniform(kw, (6, 1), jnp.float32, minval=-1.0, maxval=1.0) / 10.0

    # --- single-sample forward (module semantics: x = torch.ones(1)) --------
    x = jnp.ones((1,), jnp.float32)
    cov = jax.block_until_ready(state_covariance_forward(x, weight))
    assert cov.shape == (STATE_DIM, STATE_DIM)
    np.testing.assert_allclose(np.asarray(cov), np.asarray(_reference(x, weight)),
                               rtol=1e-5, atol=1e-7)

    # --- batched forward (amortizes per-call dispatch overhead) -------------
    B = 16
    xs = jax.random.normal(kx, (B,), jnp.float32)
    rows = jax.block_until_ready(state_covariance_forward_batched(xs, weight))
    assert rows.shape == (B, _LANES)
    rows_np = np.asarray(rows)
    for bidx in range(B):
        got = rows_np[bidx, :_FLAT].reshape(STATE_DIM, STATE_DIM)
        ref = np.asarray(_reference(xs[bidx:bidx + 1], weight))
        np.testing.assert_allclose(got, ref, rtol=1e-5, atol=1e-7)

    print("KERNEL_OK")
</pallas_src>

<mosaic_0001>
module attributes {stable_mosaic.version = 11 : i64} {
  func.func @_state_cov_kernel(%arg0: memref<1xf32, #tpu.memory_space<smem>>, %arg1: memref<6xf32, #tpu.memory_space<smem>>, %arg2: memref<21x21xf32, #tpu.memory_space<vmem>>) attributes {dimension_semantics = [], scalar_prefetch = 0 : i64, scratch_operands = 0 : i64, tpu.core_type = #tpu.core_type<tc>} {
    %c0 = arith.constant 0 : index
    %0 = memref.load %arg0[%c0] : memref<1xf32, #tpu.memory_space<smem>>
    %1 = tpu.iota {dimensions = array<i32: 0>} : vector<21x21xi32>
    %2 = tpu.iota {dimensions = array<i32: 1>} : vector<21x21xi32>
    %3 = arith.cmpi eq, %1, %2 : vector<21x21xi32>
    %cst = arith.constant 0.000000e+00 : f32
    %4 = vector.broadcast %cst : f32 to vector<21x21xf32>
    %cst_0 = arith.constant 0.000000e+00 : f32
    %5 = vector.broadcast %cst_0 : f32 to vector<21x21xf32>
    %c0_i32 = arith.constant 0 : i32
    %6 = vector.broadcast %c0_i32 : i32 to vector<21x21xi32>
    %7 = arith.cmpi sge, %1, %6 : vector<21x21xi32>
    %8 = arith.andi %3, %7 : vector<21x21xi1>
    %c2_i32 = arith.constant 2 : i32
    %9 = vector.broadcast %c2_i32 : i32 to vector<21x21xi32>
    %10 = arith.cmpi slt, %1, %9 : vector<21x21xi32>
    %11 = arith.andi %8, %10 : vector<21x21xi1>
    %c0_1 = arith.constant 0 : index
    %12 = memref.load %arg1[%c0_1] : memref<6xf32, #tpu.memory_space<smem>>
    %13 = vector.broadcast %12 : f32 to vector<21x21xf32>
    %14 = arith.select %11, %13, %4 : vector<21x21xi1>, vector<21x21xf32>
    %cst_2 = arith.constant 9.99999997E-7 : f32
    %15 = vector.broadcast %cst_2 : f32 to vector<21x21xf32>
    %16 = arith.select %11, %15, %5 : vector<21x21xi1>, vector<21x21xf32>
    %c3_i32 = arith.constant 3 : i32
    %17 = vector.broadcast %c3_i32 : i32 to vector<21x21xi32>
    %18 = arith.cmpi sge, %1, %17 : vector<21x21xi32>
    %19 = arith.andi %3, %18 : vector<21x21xi1>
    %c5_i32 = arith.constant 5 : i32
    %20 = vector.broadcast %c5_i32 : i32 to vector<21x21xi32>
    %21 = arith.cmpi slt, %1, %20 : vector<21x21xi32>
    %22 = arith.andi %19, %21 : vector<21x21xi1>
    %c1 = arith.constant 1 : index
    %23 = memref.load %arg1[%c1] : memref<6xf32, #tpu.memory_space<smem>>
    %24 = vector.broadcast %23 : f32 to vector<21x21xf32>
    %25 = arith.select %22, %24, %14 : vector<21x21xi1>, vector<21x21xf32>
    %cst_3 = arith.constant 1.000000e-01 : f32
    %26 = vector.broadcast %cst_3 : f32 to vector<21x21xf32>
    %27 = arith.select %22, %26, %16 : vector<21x21xi1>, vector<21x21xf32>
    %c9_i32 = arith.constant 9 : i32
    %28 = vector.broadcast %c9_i32 : i32 to vector<21x21xi32>
    %29 = arith.cmpi sge, %1, %28 : vector<21x21xi32>
    %30 = arith.andi %3, %29 : vector<21x21xi1>
    %c12_i32 = arith.constant 12 : i32
    %31 = vector.broadcast %c12_i32 : i32 to vector<21x21xi32>
    %32 = arith.cmpi slt, %1, %31 : vector<21x21xi32>
    %33 = arith.andi %30, %32 : vector<21x21xi1>
    %c3 = arith.constant 3 : index
    %34 = memref.load %arg1[%c3] : memref<6xf32, #tpu.memory_space<smem>>
    %35 = vector.broadcast %34 : f32 to vector<21x21xf32>
    %36 = arith.select %33, %35, %25 : vector<21x21xi1>, vector<21x21xf32>
    %cst_4 = arith.constant 9.99999993E-9 : f32
    %37 = vector.broadcast %cst_4 : f32 to vector<21x21xf32>
    %38 = arith.select %33, %37, %27 : vector<21x21xi1>, vector<21x21xf32>
    %c12_i32_5 = arith.constant 12 : i32
    %39 = vector.broadcast %c12_i32_5 : i32 to vector<21x21xi32>
    %40 = arith.cmpi sge, %1, %39 : vector<21x21xi32>
    %41 = arith.andi %3, %40 : vector<21x21xi1>
    %c15_i32 = arith.constant 15 : i32
    %42 = vector.broadcast %c15_i32 : i32 to vector<21x21xi32>
    %43 = arith.cmpi slt, %1, %42 : vector<21x21xi32>
    %44 = arith.andi %41, %43 : vector<21x21xi1>
    %c4 = arith.constant 4 : index
    %45 = memref.load %arg1[%c4] : memref<6xf32, #tpu.memory_space<smem>>
    %46 = vector.broadcast %45 : f32 to vector<21x21xf32>
    %47 = arith.select %44, %46, %36 : vector<21x21xi1>, vector<21x21xf32>
    %cst_6 = arith.constant 1.000000e-03 : f32
    %48 = vector.broadcast %cst_6 : f32 to vector<21x21xf32>
    %49 = arith.select %44, %48, %38 : vector<21x21xi1>, vector<21x21xf32>
    %c15_i32_7 = arith.constant 15 : i32
    %50 = vector.broadcast %c15_i32_7 : i32 to vector<21x21xi32>
    %51 = arith.cmpi sge, %1, %50 : vector<21x21xi32>
    %52 = arith.andi %3, %51 : vector<21x21xi1>
    %c18_i32 = arith.constant 18 : i32
    %53 = vector.broadcast %c18_i32 : i32 to vector<21x21xi32>
    %54 = arith.cmpi slt, %1, %53 : vector<21x21xi32>
    %55 = arith.andi %52, %54 : vector<21x21xi1>
    %c5 = arith.constant 5 : index
    %56 = memref.load %arg1[%c5] : memref<6xf32, #tpu.memory_space<smem>>
    %57 = vector.broadcast %56 : f32 to vector<21x21xf32>
    %58 = arith.select %55, %57, %47 : vector<21x21xi1>, vector<21x21xf32>
    %cst_8 = arith.constant 9.99999974E-6 : f32
    %59 = vector.broadcast %cst_8 : f32 to vector<21x21xf32>
    %60 = arith.select %55, %59, %49 : vector<21x21xi1>, vector<21x21xf32>
    %c18_i32_9 = arith.constant 18 : i32
    %61 = vector.broadcast %c18_i32_9 : i32 to vector<21x21xi32>
    %62 = arith.cmpi sge, %1, %61 : vector<21x21xi32>
    %63 = arith.andi %3, %62 : vector<21x21xi1>
    %c21_i32 = arith.constant 21 : i32
    %64 = vector.broadcast %c21_i32 : i32 to vector<21x21xi32>
    %65 = arith.cmpi slt, %1, %64 : vector<21x21xi32>
    %66 = arith.andi %63, %65 : vector<21x21xi1>
    %c5_10 = arith.constant 5 : index
    %67 = memref.load %arg1[%c5_10] : memref<6xf32, #tpu.memory_space<smem>>
    %68 = vector.broadcast %67 : f32 to vector<21x21xf32>
    %69 = arith.select %66, %68, %58 : vector<21x21xi1>, vector<21x21xf32>
    %cst_11 = arith.constant 0.00999999977 : f32
    %70 = vector.broadcast %cst_11 : f32 to vector<21x21xf32>
    %71 = arith.select %66, %70, %60 : vector<21x21xi1>, vector<21x21xf32>
    %72 = vector.broadcast %0 : f32 to vector<21x21xf32>
    %73 = arith.mulf %69, %72 : vector<21x21xf32>
    %74 = math.tanh %73 : vector<21x21xf32>
    %cst_12 = arith.constant 2.30258512 : f32
    %75 = vector.broadcast %cst_12 : f32 to vector<21x21xf32>
    %76 = arith.mulf %74, %75 : vector<21x21xf32>
    %77 = math.exp %76 : vector<21x21xf32>
    %78 = arith.mulf %71, %77 : vector<21x21xf32>
    %c0_13 = arith.constant 0 : index
    %c0_14 = arith.constant 0 : index
    %79 = vector.load %arg2[%c0_13, %c0_14] : memref<21x21xf32, #tpu.memory_space<vmem>>, vector<21x21xf32>
    tpu.vector_store %arg2[%c0_13, %c0_14], %78 {strides = array<i32>} : memref<21x21xf32, #tpu.memory_space<vmem>>, vector<21x21xf32>,
    return
  }
}

</mosaic_0001>

<bundles_post_ra>
// kernel: state_covariance_forward.1
= control target key start
LH: loop header
LB: loop body
LE: loop exit
PB: predicated region body
PF: predicated region fallthrough
CT: control target
= control target key end

     0   :  { %8 = vsyncpa [#allocation5], 0  ;;  %s349_s0 = inlined_call_operand.<no memory space> [shape: f32[1], index: 0, kind: input, shape index: {}]   ;;  %s350_s1 = inlined_call_operand.vmem [shape: f32[6], index: 1, kind: input, shape index: {}]   ;;  %s351_s2 = inlined_call_operand.hbm [shape: f32[21,21], index: 2, kind: output, shape index: {}]  }
   0x1   :  { %9 = vsyncpa [#allocation4], 0  ;;  %s17_s11 = sshll.u32 %s350_s1, 4  ;;  %s258_s12 = smov [#allocation3]   ;;  %s18_s11 = int_to_ptr.vmem [resolvable:$true] %s17_s11 }
   0x2   :  { %20 = dma.vmem_to_smem %s18_s11, 16, %s258_s12, [#allocation5]  }
   0x3   :  { %254 = dma.done.wait [#allocation5], 16  }
   0x4   :  { %255 = vsyncadd [#allocation5], 4294967280 }
   0x5   :  { %25 = sfence }
   0x6   :  { %v27_v0 = vlaneseq  ;;  %s48_s13 = sld [smem:[#allocation3]]  ;;  %v154_v6 = vstv %s349_s0  ;;  %v259_v32 = vmov 0.0   ;;  %s260_s0 = smov [#allocation6]  }
   0x7   :  { %s197_s14 = sld [smem:[#allocation3 + $0x1]]  ;;  %s182_s19 = sshll.u32 %s260_s0, 4  ;;  %s183_s19 = int_to_ptr.vmem [resolvable:$true] %s182_s19 }
   0x8   :  { %v28_v1 = vshrl.u32 %v27_v0, 7  ;;  %v32_v2 = vand.u32 127, %v27_v0  ;;  %s198_s15 = sld [smem:[#allocation3 + $0x3]]  ;;  %s184_s22 = sshll.u32 %s351_s2, 4  ;;  %s185_s22 = int_to_ptr.hbm [resolvable:$true] %s184_s22 }
   0x9   :  { %s281_s16 = sld [smem:[#allocation3 + $0x4]]  ;;  %s261_s23 = smov 128  }
   0xa   :  { %vm33_vm0 = vcmp.eq.s32.totalorder %v28_v1, %v32_v2  ;;  %vm42_vm1 = vcmp.lt.s32.totalorder %v28_v1, 2  ;;  %vm56_vm2 = vcmp.ge.s32.totalorder %v28_v1, 3  ;;  %vm62_vm3 = vcmp.lt.s32.totalorder %v28_v1, 5  ;;  %s200_s17 = sld [smem:[#allocation3 + $0x5]]  ;;  %s262_s24 = smov 8  }
   0xb   :  { %vm283_vm4 = vmand %vm33_vm0, %vm42_vm1  ;;  %v29_v4 = vadd.s32 8, %v28_v1  ;;  %v30_v7 = vadd.s32 16, %v28_v1 }
   0xc   :  { %v49_v5 = vstv %s48_s13  ;;  %vm59_vm5 = vmand %vm33_vm0, %vm56_vm2  ;;  %v53_v33 = vsel %vm283_vm4, 1e-06, %v259_v32 }
   0xd   :  { %v50_v8 = vsel %vm283_vm4, %v49_v5, 0.0  ;;  %vm292_vm6 = vmand %vm59_vm5, %vm62_vm3  ;;  %v69_v10 = vstv %s197_s14  ;;  %vm34_vm7 = vcmp.eq.s32.totalorder %v29_v4, %v32_v2  ;;  %vm77_vm8 = vcmp.ge.s32.totalorder %v29_v4, 9 }
   0xe   :  { %v70_v11 = vsel %vm292_vm6, %v69_v10, %v50_v8  ;;  %vm80_vm9 = vmand %vm34_vm7, %vm77_vm8  ;;  %vm83_vm10 = vcmp.lt.s32.totalorder %v29_v4, 12  ;;  %v89_v12 = vstv %s198_s15  ;;  %vm97_vm12 = vcmp.ge.s32.totalorder %v29_v4, 12 }
   0xf   :  { %v155_v13 = vmul.f32 %v154_v6, %v70_v11  ;;  %vm299_vm11 = vmand %vm80_vm9, %vm83_vm10  ;;  %vm103_vm13 = vcmp.lt.s32.totalorder %v29_v4, 15  ;;  %v109_v15 = vstv %s281_s16  ;;  %vm117_vm15 = vcmp.ge.s32.totalorder %v29_v4, 15 }
  0x10   :  { %v91_v16 = vsel %vm299_vm11, %v89_v12, 0.0  ;;  %vm100_vm14 = vmand %vm34_vm7, %vm97_vm12  ;;  %v129_v17 = vstv %s200_s17  ;;  %vm35_vm1 = vcmp.eq.s32.totalorder %v30_v7, %v32_v2  ;;  %vm124_vm2 = vcmp.lt.s32.totalorder %v30_v7, 18 }
  0x11   :  { %206 = vtanh.f32 %v155_v13  ;;  %vm307_vm0 = vmand %vm100_vm14, %vm103_vm13  ;;  %vm138_vm3 = vcmp.ge.s32.totalorder %v30_v7, 18  ;;  %vm144_vm8 = vcmp.lt.s32.totalorder %v30_v7, 21  ;;  %v94_v36 = vsel %vm299_vm11, 1e-08, %v259_v32 }
  0x12   :  { %v111_v19 = vsel %vm307_vm0, %v109_v15, %v91_v16  ;;  %vm314_vm5 = vmand %vm34_vm7, %vm117_vm15  ;;  %v73_v38 = vsel %vm292_vm6, 0.1, %v53_v33  ;;  %vm173_vm7 = vcmask 171008   ;;  %v114_v41 = vsel %vm307_vm0, 0.001, %v94_v36 }
  0x13   :  { %v131_v21 = vsel %vm314_vm5, %v129_v17, %v111_v19  ;;  %vm320_vm9 = vmand %vm35_vm1, %vm124_vm2  ;;  %v134_v44 = vsel %vm314_vm5, 1e-05, %v114_v41  ;;  %vm176_vm4 = vcmask 167936  }
  0x14   :  { %v156_v23 = vmul.f32 %v154_v6, %v131_v21  ;;  %v132_v24 = vsel %vm320_vm9, %v129_v17, 0.0  ;;  %vm141_vm10 = vmand %vm35_vm1, %vm138_vm3  ;;  %v135_v45 = vsel %vm320_vm9, 1e-05, %v259_v32 }
  0x15   :  { %vm326_vm12 = vmand %vm141_vm10, %vm144_vm8 }
  0x16   :  { %208 = vtanh.f32 %v156_v23  ;;  %v150_v26 = vsel %vm326_vm12, %v129_v17, %v132_v24  ;;  %v153_v48 = vsel %vm326_vm12, 0.01, %v135_v45 }
  0x17   :  { %v207_v27 = vpop.eup %206  ;;  %v157_v28 = vmul.f32 %v154_v6, %v150_v26 }
  0x18   :  { %v161_v29 = vmul.f32 2.3025851, %v207_v27 }
  0x19   :  { %210 = vtanh.f32 %v157_v28 }
  0x1a   :  { %v164_v30 = vmul.f32 1.442695, %v161_v29 }
  0x1c   :  { %v209_v31 = vpop.eup %208  ;;  %212 = vpow2.f32 %v164_v30 }
  0x1d   :  { %v162_v34 = vmul.f32 2.3025851, %v209_v31 }
  0x1f   :  { %v211_v35 = vpop.eup %210  ;;  %v166_v37 = vmul.f32 1.442695, %v162_v34 }
  0x20   :  { %v163_v39 = vmul.f32 2.3025851, %v211_v35 }
  0x21   :  { %214 = vpow2.f32 %v166_v37 }
  0x22   :  { %v213_v40 = vpop.eup %212  ;;  %v168_v42 = vmul.f32 1.442695, %v163_v39 }
  0x23   :  { %v170_v43 = vmul.f32 %v213_v40, %v73_v38 }
  0x24   :  { %216 = vpow2.f32 %v168_v42 }
  0x25   :  { %174 = vst.msk [vmem:[#allocation6] sm:$0xff] %vm173_vm7, %v170_v43 }
  0x27   :  { %v215_v46 = vpop.eup %214 }
  0x28   :  { %v171_v47 = vmul.f32 %v215_v46, %v134_v44 }
  0x2a   :  { %v217_v49 = vpop.eup %216  ;;  %175 = vst.msk [vmem:[#allocation6 + $0x8] sm:$0xff] %vm173_vm7, %v171_v47 }
  0x2b   :  { %v172_v50 = vmul.f32 %v217_v49, %v153_v48 }
  0x2d   :  { %177 = vst.msk [vmem:[#allocation6 + $0x10] sm:$0x1f] %vm176_vm4, %v172_v50 }
  0x2e   :  { %190 = dma.vmem_to_hbm [thread:$0]  %s183_s19, 384, %s185_s22, [#allocation4], %s261_s23, %s261_s23, %s262_s24  }
  0x2f   :  { %256 = dma.done.wait [#allocation4], 384  }
  0x30   :  { %257 = vsyncadd [#allocation4], 4294966912 }
  0x31   :  { %195 = vsyncpa [#allocation4], 1 }
  0x32   :  { %196 = vsyncpa [#allocation5], 1 }

</bundles_post_ra>
